<compile_context>
chip_gen: v6e
topology: v6e:2x2x1
jax: 0.10.0
libtpu: 0.0.40
codegen_flags: <defaults>
</compile_context>

<pallas_src>
from functools import partial

import jax
import jax.numpy as jnp
from jax.experimental import pallas as pl
from jax.experimental.pallas import tpu as pltpu


# ----------------------------------------------------------------------------- kernels
def _kv_proj_kernel(k_ref, v_ref, wk_ref, bk_ref, wv_ref, bv_ref, kp_ref, vp_ref):
    """Project one (tk, d_f) tile of K and V (bf16 MXU, fp32 accumulate)."""
    k_blk = k_ref[0]                                                        # (tk, d_f) bf16
    v_blk = v_ref[0]
    kp = jnp.dot(k_blk, wk_ref[...], preferred_element_type=jnp.float32) + bk_ref[...]
    vp = jnp.dot(v_blk, wv_ref[...], preferred_element_type=jnp.float32) + bv_ref[...]
    kp_ref[0] = kp.astype(kp_ref.dtype)
    vp_ref[0] = vp.astype(vp_ref.dtype)


def _mha_flash_kernel(q_ref, kp_ref, vp_ref,
                      wq_ref, bq_ref, wo_ref, bo_ref,
                      o_ref,
                      qp_scr, acc_scr, ml_scr,
                      *, n_h, d_h):
    """Flash attention over pre-projected K/V tiles, with fused Q/output projections.

    Online-softmax state is packed into ml_scr: m for head h in lane column h,
    l for head h in lane column n_h + h.
    """
    ki = pl.program_id(2)

    @pl.when(ki == 0)
    def _init():
        # Q projection once per (batch, q-tile); softmax scale already folded in.
        q = q_ref[0]                                                        # (tq, d_f) bf16
        qp = jnp.dot(q, wq_ref[...], preferred_element_type=jnp.float32) + bq_ref[...]
        qp_scr[...] = qp.astype(jnp.bfloat16)
        lane = jax.lax.broadcasted_iota(jnp.int32, ml_scr.shape, 1)
        ml_scr[...] = jnp.where(lane < n_h, -jnp.inf, 0.0)                  # m=-inf, l=0
        acc_scr[...] = jnp.zeros_like(acc_scr)

    kp = kp_ref[0]                                                          # (tk, d_f) bf16
    vp = vp_ref[0]
    qp = qp_scr[...]                                                        # (tq, d_f) bf16

    # Per-head online-softmax update; static lane slices (no lane-dim reshapes).
    for h in range(n_h):
        lo = h * d_h
        qh = qp[:, lo:lo + d_h]                                             # (tq, d_h)
        kh = kp[:, lo:lo + d_h]                                             # (tk, d_h)
        vh = vp[:, lo:lo + d_h]                                             # (tk, d_h)

        # scores (tq, tk): contract over d_h without materializing a transpose.
        s = jax.lax.dot_general(qh, kh, (((1,), (1,)), ((), ())),
                                preferred_element_type=jnp.float32)

        m_prev = ml_scr[:, h:h + 1]                                         # (tq, 1)
        l_prev = ml_scr[:, n_h + h:n_h + h + 1]
        m_new = jnp.maximum(m_prev, jnp.max(s, axis=-1, keepdims=True))
        alpha = jnp.exp(m_prev - m_new)
        p = jnp.exp(s - m_new)                                              # (tq, tk) f32
        ml_scr[:, n_h + h:n_h + h + 1] = alpha * l_prev + jnp.sum(p, axis=-1, keepdims=True)
        ml_scr[:, h:h + 1] = m_new

        pv = jnp.dot(p.astype(jnp.bfloat16), vh,
                     preferred_element_type=jnp.float32)                    # (tq, d_h)
        acc_scr[:, lo:lo + d_h] = alpha * acc_scr[:, lo:lo + d_h] + pv

    @pl.when(ki == pl.num_programs(2) - 1)
    def _finalize():
        # Normalize each head (EUP reciprocal, ~free), then fused output projection.
        for h in range(n_h):
            lo = h * d_h
            inv_l = pl.reciprocal(ml_scr[:, n_h + h:n_h + h + 1], approx=True)
            acc_scr[:, lo:lo + d_h] = acc_scr[:, lo:lo + d_h] * inv_l
        ctx = acc_scr[...].astype(jnp.bfloat16)                             # (tq, d_f)
        out = jnp.dot(ctx, wo_ref[...], preferred_element_type=jnp.float32) + bo_ref[...]
        o_ref[0] = out.astype(o_ref.dtype)


# ----------------------------------------------------------------------------- helpers
def _prep_params(params, d_f, scale):
    """Transpose (kernel computes x @ W^T + b like nn.Linear), cast to bf16, and fold
    the softmax scale into the Q projection (weight + bias)."""
    f32 = jnp.float32
    wq_t = (params['w_q'].astype(f32).T * scale).astype(jnp.bfloat16)
    wk_t = params['w_k'].astype(f32).T.astype(jnp.bfloat16)
    wv_t = params['w_v'].astype(f32).T.astype(jnp.bfloat16)
    wo_t = params['w_o'].astype(f32).T.astype(jnp.bfloat16)
    bq = (params['b_q'].astype(f32) * scale).reshape(1, d_f)
    bk = params['b_k'].astype(f32).reshape(1, d_f)
    bv = params['b_v'].astype(f32).reshape(1, d_f)
    bo = params['b_o'].astype(f32).reshape(1, d_f)
    return wq_t, bq, wk_t, bk, wv_t, bv, wo_t, bo


def _gen_flags():
    try:
        kind = jax.devices()[0].device_kind.lower()
    except Exception:
        kind = ""
    is_v5e = ("v5 lite" in kind) or ("v5e" in kind) or ("v5lite" in kind)
    is_v7 = "v7" in kind
    return is_v5e, is_v7


def _pick_tile(n, prefer_256):
    # 128-matched tiles on v5e (4x128^2 MXU, f32-only VPU); 256 on v6e/v7x if divisible.
    cands = (256, 128) if prefer_256 else (128,)
    for t in cands:
        if n % t == 0:
            return t
    # TODO(synk): pad to a 128 multiple + key mask instead of a full-extent tile.
    return n


def _const_spec(shape, index_map, single_buffer):
    """BlockSpec for a grid-invariant operand; single-buffered when supported."""
    if single_buffer:
        return pl.BlockSpec(shape, index_map, pipeline_mode=pl.Buffered(1))
    return pl.BlockSpec(shape, index_map)


def _padded_bytes(shape, itemsize):
    """VMEM footprint of one buffer incl. (8, 128) layout padding of the two minor dims."""
    dims = list(shape)
    if len(dims) >= 1:
        dims[-1] = pl.cdiv(dims[-1], 128) * 128
    if len(dims) >= 2:
        dims[-2] = pl.cdiv(dims[-2], 8) * 8
    n = 1
    for d in dims:
        n *= d
    return n * itemsize


def _vmem_limit(est_bytes, cap):
    return int(max(32 << 20, min(est_bytes + (8 << 20), cap)))   # +8 MiB Mosaic headroom


def _proj_vmem_bytes(tk, d_f, single_buffer_weights):
    wbuf = 1 if single_buffer_weights else 2
    w = 2 * wbuf * _padded_bytes((d_f, d_f), 2)                   # wk, wv (bf16)
    bias = 2 * wbuf * _padded_bytes((1, d_f), 4)                  # bk, bv (f32)
    streams = 2 * 4 * _padded_bytes((tk, d_f), 2)                 # k,v in + kp,vp out, x2 bufs
    return w + bias + streams


def _flash_vmem_bytes(tq, tk, d_f, ml_lanes, out_itemsize, single_buffer_weights):
    wbuf = 1 if single_buffer_weights else 2
    w = 2 * wbuf * _padded_bytes((d_f, d_f), 2)                   # wq, wo (bf16)
    bias = 2 * wbuf * _padded_bytes((1, d_f), 4)                  # bq, bo (f32)
    streams = 2 * (_padded_bytes((tq, d_f), 2)                    # q in
                   + 2 * _padded_bytes((tk, d_f), 2)              # kp, vp in
                   + _padded_bytes((tq, d_f), out_itemsize))      # out
    scratch = (_padded_bytes((tq, d_f), 2)                        # cached Q projection
               + _padded_bytes((tq, d_f), 4)                      # context accumulator
               + _padded_bytes((tq, ml_lanes), 4))                # packed m / l
    return w + bias + streams + scratch


def _proj_cost(b, n_k, d_f):
    flops = 4 * b * n_k * d_f * d_f                               # two (n_k,d_f)x(d_f,d_f)
    bytes_accessed = (2 * b * n_k * d_f * 2                       # k, v in (bf16)
                      + 2 * b * n_k * d_f * 2                     # kp, vp out (bf16)
                      + 2 * d_f * d_f * 2 + 2 * d_f * 4)          # weights + biases
    return pl.CostEstimate(flops=int(flops), transcendentals=0,
                           bytes_accessed=int(bytes_accessed))


def _flash_cost(b, n_q, n_k, d_f, n_h, tq, out_itemsize):
    flops = b * (4 * n_q * d_f * d_f                              # Q + output projections
                 + 4 * n_q * n_k * d_f)                           # QK^T + PV
    transcendentals = b * n_h * n_q * n_k                         # softmax exps
    n_qt = max(1, n_q // tq)
    bytes_accessed = (b * n_q * d_f * 2                           # q (bf16)
                      + n_qt * 2 * b * n_k * d_f * 2              # kp, vp re-streamed/q-tile
                      + b * n_q * d_f * out_itemsize              # out
                      + 2 * d_f * d_f * 2 + 2 * d_f * 4)          # weights + biases
    return pl.CostEstimate(flops=int(flops), transcendentals=int(transcendentals),
                           bytes_accessed=int(bytes_accessed))


# ----------------------------------------------------------------------------- wrappers
def _project_kv(k_bf, v_bf, wk_t, bk, wv_t, bv, *, tk, single_buffer_weights, vmem_cap):
    """Compute kp/vp (bf16) for the whole sequence once — removes the per-q-tile
    re-projection from the flash kernel and halves its resident weight footprint."""
    b, n_k, d_f = k_bf.shape

    def _wmap(bi, ki):
        return (0, 0)

    weight_spec = _const_spec((d_f, d_f), _wmap, single_buffer_weights)
    bias_spec = _const_spec((1, d_f), _wmap, single_buffer_weights)
    seq_spec = pl.BlockSpec((1, tk, d_f), lambda bi, ki: (bi, ki, 0))

    return pl.pallas_call(
        _kv_proj_kernel,
        out_shape=(jax.ShapeDtypeStruct((b, n_k, d_f), jnp.bfloat16),
                   jax.ShapeDtypeStruct((b, n_k, d_f), jnp.bfloat16)),
        grid_spec=pltpu.PrefetchScalarGridSpec(
            num_scalar_prefetch=0,
            grid=(b, n_k // tk),
            in_specs=[seq_spec, seq_spec, weight_spec, bias_spec, weight_spec, bias_spec],
            out_specs=(seq_spec, seq_spec),
        ),
        compiler_params=pltpu.CompilerParams(
            dimension_semantics=("parallel", "parallel"),
            vmem_limit_bytes=_vmem_limit(_proj_vmem_bytes(tk, d_f, single_buffer_weights),
                                         vmem_cap),
        ),
        cost_estimate=_proj_cost(b, n_k, d_f),
    )(k_bf, v_bf, wk_t, bk, wv_t, bv)


def multi_head_attn(q, k, v, params, *, n_h, tq=None, tk=None, single_buffer_weights=True):
    """q: (b, n_q, d_f); k, v: (b, n_k, d_f). Returns (b, n_q, d_f) in q's dtype."""
    b, n_q, d_f = q.shape
    _, n_k, _ = k.shape
    assert k.shape == v.shape and k.shape[0] == b and k.shape[2] == d_f
    assert d_f % n_h == 0
    d_h = d_f // n_h
    scale = float(d_f) ** (-0.5)        # NB: module uses d_f**-0.5, not d_h**-0.5.
    out_dtype = q.dtype
    out_itemsize = jnp.dtype(out_dtype).itemsize

    is_v5e, is_v7 = _gen_flags()
    prefer_256 = not is_v5e
    tq = _pick_tile(n_q, prefer_256) if tq is None else tq
    tk = _pick_tile(n_k, prefer_256) if tk is None else tk
    assert n_q % tq == 0 and n_k % tk == 0
    vmem_cap = (56 << 20) if is_v7 else (112 << 20)   # v7x: 64 MiB physical per TC

    wq_t, bq, wk_t, bk, wv_t, bv, wo_t, bo = _prep_params(params, d_f, scale)

    # bf16 activation streaming: halves HBM bytes for the re-streamed K/V tiles.
    q_bf = q.astype(jnp.bfloat16)
    k_bf = k.astype(jnp.bfloat16)
    v_bf = v.astype(jnp.bfloat16)

    # ---- stage 1: K/V projections, once per sequence (not per q-tile) ----
    kp, vp = _project_kv(k_bf, v_bf, wk_t, bk, wv_t, bv, tk=tk,
                         single_buffer_weights=single_buffer_weights, vmem_cap=vmem_cap)

    # ---- stage 2: flash attention with fused Q / output projections ----
    ml_lanes = max(128, pl.cdiv(2 * n_h, 128) * 128)
    kernel = partial(_mha_flash_kernel, n_h=n_h, d_h=d_h)

    def _wmap(bi, qi, ki):
        return (0, 0)

    weight_spec = _const_spec((d_f, d_f), _wmap, single_buffer_weights)
    bias_spec = _const_spec((1, d_f), _wmap, single_buffer_weights)

    vmem_limit = _vmem_limit(
        _flash_vmem_bytes(tq, tk, d_f, ml_lanes, out_itemsize, single_buffer_weights),
        vmem_cap)

    return pl.pallas_call(
        kernel,
        out_shape=jax.ShapeDtypeStruct((b, n_q, d_f), out_dtype),
        grid_spec=pltpu.PrefetchScalarGridSpec(
            num_scalar_prefetch=0,
            grid=(b, n_q // tq, n_k // tk),
            in_specs=[
                pl.BlockSpec((1, tq, d_f), lambda bi, qi, ki: (bi, qi, 0)),   # q  (bf16)
                pl.BlockSpec((1, tk, d_f), lambda bi, qi, ki: (bi, ki, 0)),   # kp (bf16)
                pl.BlockSpec((1, tk, d_f), lambda bi, qi, ki: (bi, ki, 0)),   # vp (bf16)
                weight_spec, bias_spec,   # w_q (pre-scaled), b_q (pre-scaled)
                weight_spec, bias_spec,   # w_o, b_o
            ],
            out_specs=pl.BlockSpec((1, tq, d_f), lambda bi, qi, ki: (bi, qi, 0)),
            scratch_shapes=[
                pltpu.VMEM((tq, d_f), jnp.bfloat16),      # cached (scaled) Q projection
                pltpu.VMEM((tq, d_f), jnp.float32),       # context accumulator
                pltpu.VMEM((tq, ml_lanes), jnp.float32),  # packed m (lane h) / l (lane n_h+h)
            ],
        ),
        compiler_params=pltpu.CompilerParams(
            dimension_semantics=("parallel", "parallel", "arbitrary"),
            vmem_limit_bytes=vmem_limit,
        ),
        cost_estimate=_flash_cost(b, n_q, n_k, d_f, n_h, tq, out_itemsize),
    )(q_bf, kp, vp, wq_t, bq, wo_t, bo)


# ----------------------------------------------------------------------------- init & refs
def _xavier_uniform(key, fan_out, fan_in, dtype=jnp.float32):
    bound = (6.0 / (fan_in + fan_out)) ** 0.5
    return jax.random.uniform(key, (fan_out, fan_in), dtype=dtype,
                              minval=-bound, maxval=bound)


def init_params(key, d_f):
    ks = jax.random.split(key, 4)
    zeros = jnp.zeros((d_f,), jnp.float32)
    return {
        'w_q': _xavier_uniform(ks[0], d_f, d_f), 'b_q': zeros,
        'w_k': _xavier_uniform(ks[1], d_f, d_f), 'b_k': zeros,
        'w_v': _xavier_uniform(ks[2], d_f, d_f), 'b_v': zeros,
        'w_o': _xavier_uniform(ks[3], d_f, d_f), 'b_o': zeros,
    }


def reference_mha_f32(q, k, v, params, *, n_h):
    """Pure-JAX fp32 reference mirroring the PyTorch forward (no masks, p_drop=0)."""
    b, n_q, d_f = q.shape
    n_k = k.shape[1]
    d_h = d_f // n_h
    scale = float(d_f) ** (-0.5)

    def lin(x, w, bias):
        return x @ w.T + bias

    qp = lin(q, params['w_q'], params['b_q']).reshape(b, n_q, n_h, d_h)
    kp = lin(k, params['w_k'], params['b_k']).reshape(b, n_k, n_h, d_h)
    vp = lin(v, params['w_v'], params['b_v']).reshape(b, n_k, n_h, d_h)
    attn = scale * jnp.einsum('bqhd,bkhd->bhqk', qp, kp)
    attn = jax.nn.softmax(attn, axis=-1)
    ctx = jnp.einsum('bhqk,bkhd->bqhd', attn, vp).reshape(b, n_q, d_f)
    return lin(ctx, params['w_o'], params['b_o'])


def reference_mha_bf16(q, k, v, params, *, n_h):
    """Reference mimicking the kernel's mixed precision (bf16 MXU inputs, fp32 accum)."""
    b, n_q, d_f = q.shape
    n_k = k.shape[1]
    d_h = d_f // n_h
    scale = float(d_f) ** (-0.5)
    wq_t, bq, wk_t, bk, wv_t, bv, wo_t, bo = _prep_params(params, d_f, scale)
    bf16, f32 = jnp.bfloat16, jnp.float32

    def proj(x, w_t, bias):
        y = jnp.einsum('bnd,df->bnf', x.astype(bf16), w_t, preferred_element_type=f32)
        return (y + bias).astype(bf16)

    qp = proj(q, wq_t, bq).reshape(b, n_q, n_h, d_h)
    kp = proj(k, wk_t, bk).reshape(b, n_k, n_h, d_h)
    vp = proj(v, wv_t, bv).reshape(b, n_k, n_h, d_h)
    s = jnp.einsum('bqhd,bkhd->bhqk', qp, kp, preferred_element_type=f32)
    p = jax.nn.softmax(s, axis=-1)
    ctx = jnp.einsum('bhqk,bkhd->bqhd', p.astype(bf16), vp, preferred_element_type=f32)
    ctx = ctx.reshape(b, n_q, d_f).astype(bf16)
    return jnp.einsum('bnd,df->bnf', ctx, wo_t, preferred_element_type=f32) + bo


if __name__ == "__main__":
    key = jax.random.PRNGKey(0)
    k_param, k_q, k_k, k_v = jax.random.split(key, 4)

    b, n_q, n_k = 2, 8, 16
    d_f, n_h = 32, 4

    params = init_params(k_param, d_f)
    q = jax.random.normal(k_q, (b, n_q, d_f), jnp.float32)
    k = jax.random.normal(k_k, (b, n_k, d_f), jnp.float32)
    v = jax.random.normal(k_v, (b, n_k, d_f), jnp.float32)

    # tk=8 -> two KV tiles: exercises the online-softmax accumulation path.
    try:
        out = jax.block_until_ready(multi_head_attn(q, k, v, params, n_h=n_h, tk=8))
        sbw = True
    except Exception:
        # Fallback if this JAX build rejects pipeline_mode=pl.Buffered(1) on weights.
        out = jax.block_until_ready(
            multi_head_attn(q, k, v, params, n_h=n_h, tk=8, single_buffer_weights=False))
        sbw = False
    assert out.shape == (b, n_q, d_f)

    # Default tiling (single KV tile at these shapes) must agree as well.
    out_default = jax.block_until_ready(
        multi_head_attn(q, k, v, params, n_h=n_h, single_buffer_weights=sbw))

    ref_mixed = reference_mha_bf16(q, k, v, params, n_h=n_h)  # same precision recipe
    ref_exact = reference_mha_f32(q, k, v, params, n_h=n_h)   # true module semantics

    assert jnp.allclose(out, ref_mixed, atol=3e-2, rtol=3e-2), "mismatch vs bf16 reference"
    assert jnp.allclose(out_default, ref_mixed, atol=3e-2, rtol=3e-2), "mismatch (default tiling)"
    assert jnp.allclose(out, ref_exact, atol=1e-1, rtol=1e-1), "mismatch vs fp32 reference"

    print("KERNEL_OK")
</pallas_src>

<mosaic_0001>
module attributes {stable_mosaic.version = 11 : i64} {
  func.func @_kv_proj_kernel(%arg0: i32, %arg1: i32, %arg2: memref<1x8x32xbf16, #tpu.memory_space<vmem>>, %arg3: memref<1x8x32xbf16, #tpu.memory_space<vmem>>, %arg4: memref<32x32xbf16, #tpu.memory_space<vmem>>, %arg5: memref<1x32xf32, #tpu.memory_space<vmem>>, %arg6: memref<32x32xbf16, #tpu.memory_space<vmem>>, %arg7: memref<1x32xf32, #tpu.memory_space<vmem>>, %arg8: memref<1x8x32xbf16, #tpu.memory_space<vmem>>, %arg9: memref<1x8x32xbf16, #tpu.memory_space<vmem>>) attributes {dimension_semantics = [#tpu.dimension_semantics<parallel>, #tpu.dimension_semantics<parallel>], iteration_bounds = array<i64: 2, 2>, scalar_prefetch = 0 : i64, scratch_operands = 0 : i64, tpu.core_type = #tpu.core_type<tc>, window_params = [{transform_indices = @transform_0, window_bounds = array<i64: 1, 8, 32>}, {transform_indices = @transform_1, window_bounds = array<i64: 1, 8, 32>}, {pipeline_mode = #tpu.pipeline_mode<synchronous>, transform_indices = @transform_2, window_bounds = array<i64: 32, 32>}, {pipeline_mode = #tpu.pipeline_mode<synchronous>, transform_indices = @transform_3, window_bounds = array<i64: 1, 32>}, {pipeline_mode = #tpu.pipeline_mode<synchronous>, transform_indices = @transform_4, window_bounds = array<i64: 32, 32>}, {pipeline_mode = #tpu.pipeline_mode<synchronous>, transform_indices = @transform_5, window_bounds = array<i64: 1, 32>}, {transform_indices = @transform_6, window_bounds = array<i64: 1, 8, 32>}, {transform_indices = @transform_7, window_bounds = array<i64: 1, 8, 32>}]} {
    %c0 = arith.constant 0 : index
    %c0_0 = arith.constant 0 : index
    %c0_1 = arith.constant 0 : index
    %0 = vector.load %arg2[%c0, %c0_0, %c0_1] : memref<1x8x32xbf16, #tpu.memory_space<vmem>>, vector<1x8x32xbf16>
    %1 = vector.shape_cast %0 : vector<1x8x32xbf16> to vector<8x32xbf16>
    %c0_2 = arith.constant 0 : index
    %c0_3 = arith.constant 0 : index
    %c0_4 = arith.constant 0 : index
    %2 = vector.load %arg3[%c0_2, %c0_3, %c0_4] : memref<1x8x32xbf16, #tpu.memory_space<vmem>>, vector<1x8x32xbf16>
    %3 = vector.shape_cast %2 : vector<1x8x32xbf16> to vector<8x32xbf16>
    %c0_5 = arith.constant 0 : index
    %c0_6 = arith.constant 0 : index
    %4 = vector.load %arg4[%c0_5, %c0_6] : memref<32x32xbf16, #tpu.memory_space<vmem>>, vector<32x32xbf16>
    %cst = arith.constant dense<0.000000e+00> : vector<8x32xf32>
    %5 = tpu.matmul %1, %4, %cst {dimension_numbers = #tpu.dot_dimension_numbers<[1], [0], [0], [1], [0, 0, 1, 1], [], []>} : vector<8x32xbf16>, vector<32x32xbf16>, vector<8x32xf32> -> vector<8x32xf32>
    %c0_7 = arith.constant 0 : index
    %c0_8 = arith.constant 0 : index
    %6 = vector.load %arg5[%c0_7, %c0_8] : memref<1x32xf32, #tpu.memory_space<vmem>>, vector<1x32xf32>
    %7 = vector.broadcast %6 : vector<1x32xf32> to vector<8x32xf32>
    %8 = arith.addf %5, %7 : vector<8x32xf32>
    %c0_9 = arith.constant 0 : index
    %c0_10 = arith.constant 0 : index
    %9 = vector.load %arg6[%c0_9, %c0_10] : memref<32x32xbf16, #tpu.memory_space<vmem>>, vector<32x32xbf16>
    %cst_11 = arith.constant dense<0.000000e+00> : vector<8x32xf32>
    %10 = tpu.matmul %3, %9, %cst_11 {dimension_numbers = #tpu.dot_dimension_numbers<[1], [0], [0], [1], [0, 0, 1, 1], [], []>} : vector<8x32xbf16>, vector<32x32xbf16>, vector<8x32xf32> -> vector<8x32xf32>
    %c0_12 = arith.constant 0 : index
    %c0_13 = arith.constant 0 : index
    %11 = vector.load %arg7[%c0_12, %c0_13] : memref<1x32xf32, #tpu.memory_space<vmem>>, vector<1x32xf32>
    %12 = vector.broadcast %11 : vector<1x32xf32> to vector<8x32xf32>
    %13 = arith.addf %10, %12 : vector<8x32xf32>
    %14 = arith.truncf %8 : vector<8x32xf32> to vector<8x32xbf16>
    %c0_14 = arith.constant 0 : index
    %c0_15 = arith.constant 0 : index
    %c0_16 = arith.constant 0 : index
    %15 = vector.load %arg8[%c0_14, %c0_15, %c0_16] : memref<1x8x32xbf16, #tpu.memory_space<vmem>>, vector<1x8x32xbf16>
    %16 = vector.shape_cast %15 : vector<1x8x32xbf16> to vector<8x32xbf16>
    %17 = vector.shape_cast %14 : vector<8x32xbf16> to vector<1x8x32xbf16>
    tpu.vector_store %arg8[%c0_14, %c0_15, %c0_16], %17 {strides = array<i32>} : memref<1x8x32xbf16, #tpu.memory_space<vmem>>, vector<1x8x32xbf16>,
    %18 = arith.truncf %13 : vector<8x32xf32> to vector<8x32xbf16>
    %c0_17 = arith.constant 0 : index
    %c0_18 = arith.constant 0 : index
    %c0_19 = arith.constant 0 : index
    %19 = vector.load %arg9[%c0_17, %c0_18, %c0_19] : memref<1x8x32xbf16, #tpu.memory_space<vmem>>, vector<1x8x32xbf16>
    %20 = vector.shape_cast %19 : vector<1x8x32xbf16> to vector<8x32xbf16>
    %21 = vector.shape_cast %18 : vector<8x32xbf16> to vector<1x8x32xbf16>
    tpu.vector_store %arg9[%c0_17, %c0_18, %c0_19], %21 {strides = array<i32>} : memref<1x8x32xbf16, #tpu.memory_space<vmem>>, vector<1x8x32xbf16>,
    return
  }
  func.func @transform_0(%arg0: i32, %arg1: i32) -> (i32, i32, i32) {
    %c0_i32 = arith.constant 0 : i32
    %c0_i32_0 = arith.constant 0 : i32
    return %arg0, %arg1, %c0_i32 : i32, i32, i32
  }
  func.func @transform_1(%arg0: i32, %arg1: i32) -> (i32, i32, i32) {
    %c0_i32 = arith.constant 0 : i32
    %c0_i32_0 = arith.constant 0 : i32
    return %arg0, %arg1, %c0_i32 : i32, i32, i32
  }
  func.func @transform_2(%arg0: i32, %arg1: i32) -> (i32, i32) {
    %c0_i32 = arith.constant 0 : i32
    %c0_i32_0 = arith.constant 0 : i32
    %c0_i32_1 = arith.constant 0 : i32
    return %c0_i32, %c0_i32_0 : i32, i32
  }
  func.func @transform_3(%arg0: i32, %arg1: i32) -> (i32, i32) {
    %c0_i32 = arith.constant 0 : i32
    %c0_i32_0 = arith.constant 0 : i32
    %c0_i32_1 = arith.constant 0 : i32
    return %c0_i32, %c0_i32_0 : i32, i32
  }
  func.func @transform_4(%arg0: i32, %arg1: i32) -> (i32, i32) {
    %c0_i32 = arith.constant 0 : i32
    %c0_i32_0 = arith.constant 0 : i32
    %c0_i32_1 = arith.constant 0 : i32
    return %c0_i32, %c0_i32_0 : i32, i32
  }
  func.func @transform_5(%arg0: i32, %arg1: i32) -> (i32, i32) {
    %c0_i32 = arith.constant 0 : i32
    %c0_i32_0 = arith.constant 0 : i32
    %c0_i32_1 = arith.constant 0 : i32
    return %c0_i32, %c0_i32_0 : i32, i32
  }
  func.func @transform_6(%arg0: i32, %arg1: i32) -> (i32, i32, i32) {
    %c0_i32 = arith.constant 0 : i32
    %c0_i32_0 = arith.constant 0 : i32
    return %arg0, %arg1, %c0_i32 : i32, i32, i32
  }
  func.func @transform_7(%arg0: i32, %arg1: i32) -> (i32, i32, i32) {
    %c0_i32 = arith.constant 0 : i32
    %c0_i32_0 = arith.constant 0 : i32
    return %arg0, %arg1, %c0_i32 : i32, i32, i32
  }
}

module attributes {stable_mosaic.version = 11 : i64} {
  func.func @_kv_proj_kernel(%arg0: i32, %arg1: i32, %arg2: memref<1x8x32xbf16, #tpu.memory_space<vmem>>, %arg3: memref<1x8x32xbf16, #tpu.memory_space<vmem>>, %arg4: memref<32x32xbf16, #tpu.memory_space<vmem>>, %arg5: memref<1x32xf32, #tpu.memory_space<vmem>>, %arg6: memref<32x32xbf16, #tpu.memory_space<vmem>>, %arg7: memref<1x32xf32, #tpu.memory_space<vmem>>, %arg8: memref<1x8x32xbf16, #tpu.memory_space<vmem>>, %arg9: memref<1x8x32xbf16, #tpu.memory_space<vmem>>) attributes {dimension_semantics = [#tpu.dimension_semantics<parallel>, #tpu.dimension_semantics<parallel>], iteration_bounds = array<i64: 2, 2>, scalar_prefetch = 0 : i64, scratch_operands = 0 : i64, tpu.core_type = #tpu.core_type<tc>, window_params = [{transform_indices = @transform_0, window_bounds = array<i64: 1, 8, 32>}, {transform_indices = @transform_1, window_bounds = array<i64: 1, 8, 32>}, {pipeline_mode = #tpu.pipeline_mode<synchronous>, transform_indices = @transform_2, window_bounds = array<i64: 32, 32>}, {pipeline_mode = #tpu.pipeline_mode<synchronous>, transform_indices = @transform_3, window_bounds = array<i64: 1, 32>}, {pipeline_mode = #tpu.pipeline_mode<synchronous>, transform_indices = @transform_4, window_bounds = array<i64: 32, 32>}, {pipeline_mode = #tpu.pipeline_mode<synchronous>, transform_indices = @transform_5, window_bounds = array<i64: 1, 32>}, {transform_indices = @transform_6, window_bounds = array<i64: 1, 8, 32>}, {transform_indices = @transform_7, window_bounds = array<i64: 1, 8, 32>}]} {
    %c0 = arith.constant 0 : index
    %c0_0 = arith.constant 0 : index
    %c0_1 = arith.constant 0 : index
    %0 = vector.load %arg2[%c0, %c0_0, %c0_1] : memref<1x8x32xbf16, #tpu.memory_space<vmem>>, vector<1x8x32xbf16>
    %1 = vector.shape_cast %0 : vector<1x8x32xbf16> to vector<8x32xbf16>
    %c0_2 = arith.constant 0 : index
    %c0_3 = arith.constant 0 : index
    %c0_4 = arith.constant 0 : index
    %2 = vector.load %arg3[%c0_2, %c0_3, %c0_4] : memref<1x8x32xbf16, #tpu.memory_space<vmem>>, vector<1x8x32xbf16>
    %3 = vector.shape_cast %2 : vector<1x8x32xbf16> to vector<8x32xbf16>
    %c0_5 = arith.constant 0 : index
    %c0_6 = arith.constant 0 : index
    %4 = vector.load %arg4[%c0_5, %c0_6] : memref<32x32xbf16, #tpu.memory_space<vmem>>, vector<32x32xbf16>
    %cst = arith.constant dense<0.000000e+00> : vector<8x32xf32>
    %5 = tpu.matmul %1, %4, %cst {dimension_numbers = #tpu.dot_dimension_numbers<[1], [0], [0], [1], [0, 0, 1, 1], [], []>} : vector<8x32xbf16>, vector<32x32xbf16>, vector<8x32xf32> -> vector<8x32xf32>
    %c0_7 = arith.constant 0 : index
    %c0_8 = arith.constant 0 : index
    %6 = vector.load %arg5[%c0_7, %c0_8] : memref<1x32xf32, #tpu.memory_space<vmem>>, vector<1x32xf32>
    %7 = vector.broadcast %6 : vector<1x32xf32> to vector<8x32xf32>
    %8 = arith.addf %5, %7 : vector<8x32xf32>
    %c0_9 = arith.constant 0 : index
    %c0_10 = arith.constant 0 : index
    %9 = vector.load %arg6[%c0_9, %c0_10] : memref<32x32xbf16, #tpu.memory_space<vmem>>, vector<32x32xbf16>
    %cst_11 = arith.constant dense<0.000000e+00> : vector<8x32xf32>
    %10 = tpu.matmul %3, %9, %cst_11 {dimension_numbers = #tpu.dot_dimension_numbers<[1], [0], [0], [1], [0, 0, 1, 1], [], []>} : vector<8x32xbf16>, vector<32x32xbf16>, vector<8x32xf32> -> vector<8x32xf32>
    %c0_12 = arith.constant 0 : index
    %c0_13 = arith.constant 0 : index
    %11 = vector.load %arg7[%c0_12, %c0_13] : memref<1x32xf32, #tpu.memory_space<vmem>>, vector<1x32xf32>
    %12 = vector.broadcast %11 : vector<1x32xf32> to vector<8x32xf32>
    %13 = arith.addf %10, %12 : vector<8x32xf32>
    %14 = arith.truncf %8 : vector<8x32xf32> to vector<8x32xbf16>
    %c0_14 = arith.constant 0 : index
    %c0_15 = arith.constant 0 : index
    %c0_16 = arith.constant 0 : index
    %15 = vector.load %arg8[%c0_14, %c0_15, %c0_16] : memref<1x8x32xbf16, #tpu.memory_space<vmem>>, vector<1x8x32xbf16>
    %16 = vector.shape_cast %15 : vector<1x8x32xbf16> to vector<8x32xbf16>
    %17 = vector.shape_cast %14 : vector<8x32xbf16> to vector<1x8x32xbf16>
    tpu.vector_store %arg8[%c0_14, %c0_15, %c0_16], %17 {strides = array<i32>} : memref<1x8x32xbf16, #tpu.memory_space<vmem>>, vector<1x8x32xbf16>,
    %18 = arith.truncf %13 : vector<8x32xf32> to vector<8x32xbf16>
    %c0_17 = arith.constant 0 : index
    %c0_18 = arith.constant 0 : index
    %c0_19 = arith.constant 0 : index
    %19 = vector.load %arg9[%c0_17, %c0_18, %c0_19] : memref<1x8x32xbf16, #tpu.memory_space<vmem>>, vector<1x8x32xbf16>
    %20 = vector.shape_cast %19 : vector<1x8x32xbf16> to vector<8x32xbf16>
    %21 = vector.shape_cast %18 : vector<8x32xbf16> to vector<1x8x32xbf16>
    tpu.vector_store %arg9[%c0_17, %c0_18, %c0_19], %21 {strides = array<i32>} : memref<1x8x32xbf16, #tpu.memory_space<vmem>>, vector<1x8x32xbf16>,
    return
  }
  func.func @transform_0(%arg0: i32, %arg1: i32) -> (i32, i32, i32) {
    %c0_i32 = arith.constant 0 : i32
    %c0_i32_0 = arith.constant 0 : i32
    return %arg0, %arg1, %c0_i32 : i32, i32, i32
  }
  func.func @transform_1(%arg0: i32, %arg1: i32) -> (i32, i32, i32) {
    %c0_i32 = arith.constant 0 : i32
    %c0_i32_0 = arith.constant 0 : i32
    return %arg0, %arg1, %c0_i32 : i32, i32, i32
  }
  func.func @transform_2(%arg0: i32, %arg1: i32) -> (i32, i32) {
    %c0_i32 = arith.constant 0 : i32
    %c0_i32_0 = arith.constant 0 : i32
    %c0_i32_1 = arith.constant 0 : i32
    return %c0_i32, %c0_i32_0 : i32, i32
  }
  func.func @transform_3(%arg0: i32, %arg1: i32) -> (i32, i32) {
    %c0_i32 = arith.constant 0 : i32
    %c0_i32_0 = arith.constant 0 : i32
    %c0_i32_1 = arith.constant 0 : i32
    return %c0_i32, %c0_i32_0 : i32, i32
  }
  func.func @transform_4(%arg0: i32, %arg1: i32) -> (i32, i32) {
    %c0_i32 = arith.constant 0 : i32
    %c0_i32_0 = arith.constant 0 : i32
    %c0_i32_1 = arith.constant 0 : i32
    return %c0_i32, %c0_i32_0 : i32, i32
  }
  func.func @transform_5(%arg0: i32, %arg1: i32) -> (i32, i32) {
    %c0_i32 = arith.constant 0 : i32
    %c0_i32_0 = arith.constant 0 : i32
    %c0_i32_1 = arith.constant 0 : i32
    return %c0_i32, %c0_i32_0 : i32, i32
  }
  func.func @transform_6(%arg0: i32, %arg1: i32) -> (i32, i32, i32) {
    %c0_i32 = arith.constant 0 : i32
    %c0_i32_0 = arith.constant 0 : i32
    return %arg0, %arg1, %c0_i32 : i32, i32, i32
  }
  func.func @transform_7(%arg0: i32, %arg1: i32) -> (i32, i32, i32) {
    %c0_i32 = arith.constant 0 : i32
    %c0_i32_0 = arith.constant 0 : i32
    return %arg0, %arg1, %c0_i32 : i32, i32, i32
  }
}

</mosaic_0001>

<bundles_post_ra>
// kernel: tpu_custom_call.1
= control target key start
LH: loop header
LB: loop body
LE: loop exit
PB: predicated region body
PF: predicated region fallthrough
CT: control target
= control target key end

     0   :  { %s1491_s0 = inlined_call_operand.hbm [shape: bf16[2,16,32], index: 0, kind: input, shape index: {}]   ;;  %s1492_s1 = inlined_call_operand.hbm [shape: bf16[2,16,32], index: 1, kind: input, shape index: {}]   ;;  %s1493_s2 = inlined_call_operand.hbm [shape: bf16[32,32], index: 2, kind: input, shape index: {}]   ;;  %s1494_s3 = inlined_call_operand.vmem [shape: f32[1,32], index: 3, kind: input, shape index: {}]   ;;  %s1495_s4 = inlined_call_operand.hbm [shape: bf16[32,32], index: 4, kind: input, shape index: {}]   ;;  %s1496_s5 = inlined_call_operand.vmem [shape: f32[1,32], index: 5, kind: input, shape index: {}]   ;;  %s1497_s6 = inlined_call_operand.hbm [shape: bf16[2,16,32], index: 6, kind: output, shape index: {0}]   ;;  %s1498_s7 = inlined_call_operand.hbm [shape: bf16[2,16,32], index: 7, kind: output, shape index: {1}]  }
   0x1   :  { %1507 = sst [smem:[#allocation23_spill]] %s1493_s2 }
   0x2   :  { %1508 = sst [smem:[#allocation24_spill]] %s1495_s4 }
   0x3   :  { %1509 = sst [smem:[#allocation25_spill]] %s1496_s5 }
   0x4   :  { %1510 = sst [smem:[#allocation26_spill]] %s1497_s6 }
   0x5   :  { %1511 = sst [smem:[#allocation27_spill]] %s1498_s7 }
   0x6   :  { %13 = vsyncpa [#allocation3], 0 }
   0x7   :  { %15 = vsyncpa [#allocation3 + $0x1], 0 }
   0x8   :  { %16 = vsyncpa [#allocation6], 0 }
   0x9   :  { %18 = vsyncpa [#allocation6 + $0x1], 0 }
   0xa   :  { %19 = vsyncpa [#allocation9], 0 }
   0xb   :  { %20 = vsyncpa [#allocation4], 0 }
   0xc   :  { %22 = vsyncpa [#allocation4 + $0x1], 0 }
   0xd   :  { %23 = vsyncpa [#allocation12], 0 }
   0xe   :  { %25 = vsyncpa [#allocation12 + $0x1], 0  ;;  %s1207_s24 = smov 0   ;;  %s1209_s25 = smov 0  }
   0xf   :  { %s1211_s26 = smov 0   ;;  %s1213_s27 = smov 0  }
  0x10   :  { %s1215_s28 = smov 0   ;;  %s1217_s29 = smov 0  }
  0x11   :  { %s1219_s30 = smov 0   ;;  %s1221_s8 = smov 0  }
  0x12 LB: > { %1512 = sst [smem:[#allocation19_spill]] %s1127_s24  ;;  %s1248_s9 = sadd.s32 4294967295, %s1155_s8   ;;  %s1155_s8 = sphi %s1221_s8, %s31_s8   ;;  %s1151_s30 = sphi %s1219_s30, %s1545_s30   ;;  %s1147_s29 = sphi %s1217_s29, %s1544_s29   ;;  %s1143_s28 = sphi %s1215_s28, %s1543_s28   ;;  %s1139_s27 = sphi %s1213_s27, %s1542_s27   ;;  %s1135_s26 = sphi %s1211_s26, %s1541_s26   ;;  %s1131_s25 = sphi %s1209_s25, %s1540_s25   ;;  %s1127_s24 = sphi %s1207_s24, %s1539_s24  }
  0x13   : > { %s736_s10 = sadd.s32 4294967294, %s1155_s8   ;;  %p65_p0 = scmp.ne.s32.totalorder %s1131_s25, %s1127_s24 }
  0x14   : > { %p1499_p1 = scmp.eq.s32.totalorder %s1248_s9, 0  ;;  %p209_p3 = scmp.eq.s32.totalorder %s736_s10, 3 }
  0x15   : > { %p737_p5 = scmp.ge.s32.totalorder %s1155_s8, 1  ;;  %p244_p7 = scmp.lt.s32.totalorder %s1155_s8, 5 }
  0x16   : > { %p1257_p4 = por %p1499_p1, %p65_p0  ;;  %p1262_p6 = por %p209_p3, %p65_p0 }
  0x17   : > { %p1267_p8 = pnand %p737_p5, %p244_p7  ;;  %s1157_s14 = smov [#allocation7]  }
  0x18   : > { %s1514_s12 = scalar_select %p1262_p6, 1, 0 }
  0x19   : > { %s256_s15 = sshll.u32 %s1157_s14, 4  ;;  %p808_p9 = pneg %p1267_p8  ;;  %s257_s15 = int_to_ptr.vmem [resolvable:$true] %s256_s15 }
  0x1a   : > { %1515 = sst [smem:[#allocation20_spill]] %s1514_s12  ;;  %s1158_s17 = smov [#allocation8]  }
  0x1b   : > { %p1275_p10 = pnand %p808_p9, %p1499_p1  ;;  %s272_s18 = sshll.u32 %s1158_s17, 4  ;;  %s273_s18 = int_to_ptr.vmem [resolvable:$true] %s272_s18 }
  0x1c   : > { %s920_s19 = scalar_lea.vmem %s257_s15, 256  ;;  %p928_p3 = scmp.lt.s32.totalorder %s257_s15, %s257_s15 }
  0x1d   : > { %p911_p11 = pneg %p1275_p10  ;;  %p921_p12 = scmp.ne.s32.totalorder %s257_s15, %s920_s19 }
  0x1e   : > { %p929_p5 = scmp.lt.s32.totalorder %s920_s19, %s920_s19 }
  0x1f   : > { %p923_p13 = pnand %p921_p12, %p911_p11 }
  0x20   : > { %p930_p7 = por %p929_p5, %p928_p3 }
  0x21   : > { %p924_p0 = pneg %p923_p13 }
  0x23   : > { %p931_p9 = pnand %p930_p7, %p924_p0 }
  0x25   : > { %934 = shalt.err (!%p931_p9)
}
  0x26   : > { %s1159_s20 = smov 64   ;;  %s1160_s21 = smov 4  }
  0x27   : > { %s1518_s2 = sld [smem:[#allocation23_spill]]  ;;  %s946_s10 = scalar_lea.vmem %s273_s18, 256 }
  0x28   : > { %p947_p1 = scmp.ne.s32.totalorder %s273_s18, %s946_s10  ;;  %p954_p2 = scmp.lt.s32.totalorder %s273_s18, %s273_s18 }
  0x29   : > { %p955_p6 = scmp.lt.s32.totalorder %s946_s10, %s946_s10 }
  0x2a   : > { %p949_p12 = pnand %p947_p1, %p911_p11 }
  0x2b   : > { %p956_p3 = por %p955_p6, %p954_p2 }
  0x2c   : > { %p950_p13 = pneg %p949_p12 }
  0x2d   : > { %811 = dma.hbm_to_vmem [thread:$0]  (!%p1275_p10), %s1518_s2, 256, %s257_s15, [#allocation6], %s1159_s20, %s1159_s20, %s1160_s21  }
  0x2e   : > { %p957_p0 = pnand %p956_p3, %p950_p13 }
  0x30   : > { %960 = shalt.err (!%p957_p0)
}
  0x31   : > { %s1519_s4 = sld [smem:[#allocation24_spill]]  ;;  %s40_s15 = sadd.s32 1, %s1147_s29 }
  0x32   : > { %s43_s19 = sadd.s32 1, %s1151_s30  ;;  %p41_p1 = scmp.ge.s32.totalorder %s40_s15, 2 }
  0x33   : > { %s52_s16 = sadd.s32 1, %s1135_s26  ;;  %p59_p2 = scmp.ne.s32.totalorder %s1135_s26, %s1131_s25 }
  0x34   : > { %p60_p6 = scmp.eq.s32.totalorder %s1155_s8, 0  ;;  %s1547_s15 = smov (%p41_p1, %s40_s15), 0 }
  0x35   : > { %1520 = sst [smem:[#allocation21_spill]] %s1547_s15  ;;  %s1549_s19 = smov (!%p41_p1, %s43_s19), %s1151_s30 }
  0x36   : > { %s48_s22 = ssub.s32 %s1147_s29, %s1547_s15  ;;  %p1308_p11 = por %p60_p6, %p59_p2 }
  0x37   : > { %814 = dma.hbm_to_vmem [thread:$0]  (!%p1275_p10), %s1519_s4, 256, %s273_s18, [#allocation9], %s1159_s20, %s1159_s20, %s1160_s21  }
  0x38   : > { %p45_p10 = scmp.ge.s32.totalorder %s1549_s19, 2  ;;  %p1522_p5 = scmp.eq.s32.totalorder %s1248_s9, 3 }
  0x39   : > { %p831_p9 = scmp.lt.s32.totalorder %s1155_s8, 4  ;;  %s289_s20 = sand.u32 1, %s1135_s26  }
  0x3a   : > { %p1314_p7 = por %p1522_p5, %p59_p2  ;;  %s1551_s19 = smov (%p45_p10, %s1549_s19), 0 }
  0x3b   : > { %s1322_s21 = sshll.u32 %s289_s20, 2  ;;  %s47_s10 = ssub.s32 %s1151_s30, %s1551_s19 }
  0x3c   : > { %s1523_s18 = scalar_select %p1314_p7, 1, 0 }
  0x3d   : > { %s49_s14 = sor.u32 %s48_s22, %s47_s10  ;;  %s742_s17 = sshll.u32 %s1151_s30, 1 }
  0x3e   : > { %1524 = sst [smem:[#allocation22_spill]] %s1523_s18  ;;  %p50_p12 = scmp.eq.s32.totalorder %s49_s14, 0 }
  0x3f   : > { %s298_s2 = sadd.s32 %s1147_s29, %s742_s17  ;;  %s293_s15 = scalar_lea.vmem [#allocation2], %s1322_s21 }
  0x40   : > { %s743_s4 = sshll.u32 %s298_s2, 6  ;;  %s302_s12 = sshll.u32 %s293_s15, 4  ;;  %s303_s12 = int_to_ptr.vmem [resolvable:$true] %s302_s12 }
  0x41   : > { %s1330_s24 = scalar_select %p50_p12, %s1135_s26, %s52_s16  }
  0x42   : > { %s300_s18 = scalar_lea.hbm %s1491_s0, %s743_s4  ;;  %p1339_p13 = pnand %p831_p9, %p1308_p11 }
  0x43   : > { %s1346_s2 = scalar_lea.hbm %s1492_s1, %s743_s4  ;;  %s309_s15 = sand.u32 1, %s1155_s8  }
  0x44   : > { %s290_s16 = scalar_lea.sflag [#allocation3], %s289_s20  ;;  %p963_p3 = pneg %p1339_p13 }
  0x45   : > { %s974_s6 = scalar_lea.vmem %s303_s12, 64  ;;  %s1161_s7 = smov [#allocation2]  }
  0x46   : > { %p975_p0 = scmp.ne.s32.totalorder %s303_s12, %s974_s6  ;;  %s979_s23 = sshll.u32 %s1161_s7, 4  ;;  %s980_s23 = int_to_ptr.vmem [resolvable:$false] %s979_s23 }
  0x47   : > { %s981_s14 = scalar_lea.vmem %s980_s23, 128  ;;  %p982_p6 = scmp.lt.s32.totalorder %s303_s12, %s980_s23 }
  0x48   : > { %p977_p1 = pnand %p975_p0, %p963_p3  ;;  %p983_p11 = scmp.lt.s32.totalorder %s981_s14, %s974_s6 }
  0x4a   : > { %p978_p2 = pneg %p977_p1  ;;  %p984_p10 = por %p983_p11, %p982_p6 }
  0x4c   : > { %p985_p5 = pnand %p984_p10, %p978_p2 }
  0x4e   : > { %988 = shalt.err (!%p985_p5)
}
  0x4f   : > { %818 = dma.hbm_to_vmem [thread:$0]  (!%p1339_p13), %s300_s18, 64, %s303_s12, %s290_s16  }
  0x50   : > { %s313_s4 = scalar_lea.vmem [#allocation5], %s1322_s21  ;;  %s310_s17 = scalar_lea.sflag [#allocation6], %s309_s15 }
  0x51   : > { %s322_s20 = sshll.u32 %s313_s4, 4  ;;  %s1162_s10 = smov [#allocation5]   ;;  %s323_s20 = int_to_ptr.vmem [resolvable:$true] %s322_s20 }
  0x52   : > { %s1002_s22 = scalar_lea.vmem %s323_s20, 64  ;;  %s1007_s6 = sshll.u32 %s1162_s10, 4  ;;  %s1008_s6 = int_to_ptr.vmem [resolvable:$false] %s1007_s6 }
  0x53   : > { %p1003_p9 = scmp.ne.s32.totalorder %s323_s20, %s1002_s22  ;;  %s1009_s7 = scalar_lea.vmem %s1008_s6, 128 }
  0x54   : > { %p1010_p1 = scmp.lt.s32.totalorder %s323_s20, %s1008_s6  ;;  %p1011_p2 = scmp.lt.s32.totalorder %s1009_s7, %s1002_s22 }
  0x55   : > { %p1005_p12 = pnand %p1003_p9, %p963_p3 }
  0x56   : > { %p1012_p6 = por %p1011_p2, %p1010_p1 }
  0x57   : > { %p1006_p0 = pneg %p1005_p12 }
  0x59   : > { %p1013_p11 = pnand %p1012_p6, %p1006_p0 }
  0x5b   : > { %1016 = shalt.err (!%p1013_p11)
}
  0x5c   : > { %821 = dma.hbm_to_vmem [thread:$0]  (!%p1339_p13), %s1346_s2, 64, %s323_s20, %s310_s17  }
  0x5d   : > { %331 = sbr.rel (%p1267_p8) target bundleno = 351 (0x15f), region = 44  ;;  %s1366_s12 = sand.u32 (!%p1267_p8), 1, %s1131_s25  }
  0x5e   : > { %s1369_s18 = sshll.u32 (!%p1267_p8), %s1366_s12, 2  ;;  %s334_s21 = scalar_lea.sflag (!%p1267_p8), [#allocation3], %s1366_s12 }
  0x5f   : > { %s337_s15 = scalar_lea.vmem (!%p1267_p8), [#allocation2], %s1369_s18 }
  0x62   : > { %1102 = dma.done.wait (%p1257_p4), %s334_s21, 64  }
  0x63   : > { %1104 = vsyncadd (%p1257_p4), %s334_s21, 4294967232  ;;  %s342_s5 = sand.u32 1, %s1248_s9   ;;  %s346_s2 = scalar_lea.vmem [#allocation5], %s1369_s18 }
  0x64   : > { %s343_s13 = scalar_lea.sflag [#allocation6], %s342_s5 }
  0x65   : > { %1106 = dma.done.wait (%p1257_p4), %s343_s13, 64  }
  0x66   : > { %1108 = vsyncadd (%p1257_p4), %s343_s13, 4294967232  ;;  %p1526_p8 = scmp.eq.s32.totalorder %s1248_s9, 0 }
  0x68   : > { %1110 = dma.done.wait (%p1526_p8), [#allocation6], 256   ;;  %p1527_p13 = pmov %p1526_p8 }
  0x69   : > { %p1528_p3 = pmov %p1526_p8 }
  0x6a   : > { %1112 = vsyncadd (%p1527_p13), [#allocation6], 4294967040 }
  0x6b   : > { %1114 = dma.done.wait (%p1528_p3), [#allocation9], 256   ;;  %p1529_p10 = pmov %p1528_p3 }
  0x6c   : > { %v1163_v0 = vmov 0.0   ;;  %vm1164_vm0 = vmmov 0   ;;  %v905_v1 = vld [vmem:[#allocation7 + $0x8] sm:$0xff]   ;;  %v906_v2 = vld [vmem:[#allocation8 + $0x8] sm:$0xff]   ;;  %v907_v3 = vld [vmem:[#allocation7] sm:$0xff]   ;;  %vm421_vm1 = vcmask 261120  }
  0x6d   : > { %1116 = vsyncadd (%p1529_p10), [#allocation9], 4294967040  ;;  %776 = vmatprep.subr.bf16.mxu0 %v1163_v0  ;;  %784 = vmatprep.subr.bf16.mxu1 %v1163_v0  ;;  %v908_v4 = vld [vmem:[#allocation8] sm:$0xff]   ;;  %v397_v6 = vld [vmem:[%s346_s2] sm:$0xf]  ;;  %s764_s9 = sshll.u32 %s1143_s28, 1 }
  0x6e   : > { %780 = vmatprep.mubr.msk.bf16.mxu0 %vm1164_vm0, %v1163_v0  ;;  %788 = vmatprep.mubr.msk.bf16.mxu1 %vm1164_vm0, %v1163_v0  ;;  %v396_v5 = vld [vmem:[%s337_s15] sm:$0xf]  ;;  %s553_s11 = sadd.s32 %s1139_s27, %s764_s9  ;;  %s1530_s20 = sld [smem:[#allocation25_spill]]  ;;  %vm532_vm2 = vcmask 257024  }
  0x6f   : > { %777 = vmatpush3.bf16.msra.mxu0 %v905_v1  ;;  %785 = vmatpush3.bf16.msra.mxu1 %v906_v2  ;;  %v754_v7 = vld [vmem:[%s1494_s3] ss:$0 sm:$0xff]  ;;  %s765_s17 = sshll.u32 %s553_s11, 6  ;;  %s387_s22 = scalar_lea.vmem [#allocation10], %s1369_s18 }
  0x70   : > { %778 = vmatprep.subr.bf16.mxu0 %v1163_v0  ;;  %786 = vmatprep.subr.bf16.mxu1 %v1163_v0  ;;  %s557_s10 = sshll.u32 %s387_s22, 4  ;;  %s394_s6 = scalar_lea.vmem [#allocation11], %s1369_s18  ;;  %s1408_s10 = int_to_ptr.vmem [resolvable:$true] %s557_s10 }
  0x71   : > { %s572_s7 = sshll.u32 %s394_s6, 4  ;;  %s1532_s15 = sld [smem:[#allocation26_spill]]  ;;  %s1415_s7 = int_to_ptr.vmem [resolvable:$true] %s572_s7 }
  0x72   : > { %s1533_s9 = sld [smem:[#allocation27_spill]]  ;;  %s537_s16 = scalar_lea.sflag [#allocation4], %s1366_s12 }
  0x73   : > { %779 = vmatpush3.bf16.msra.mxu0 %v907_v3  ;;  %787 = vmatpush3.bf16.msra.mxu1 %v908_v4  ;;  %s1017_s23 = scalar_lea.vmem %s1408_s10, 64  ;;  %s1165_s14 = smov [#allocation10]  }
  0x74   : > { %v758_v8 = vld [vmem:[%s1530_s20] ss:$0 sm:$0xff]  ;;  %p1018_p4 = scmp.ne.s32.totalorder %s1408_s10, %s1017_s23  ;;  %s1021_s4 = sshll.u32 %s1165_s14, 4  ;;  %s1022_s4 = int_to_ptr.vmem [resolvable:$false] %s1021_s4 }
  0x75   : > { %s1023_s20 = scalar_lea.vmem %s1022_s4, 128  ;;  %p1024_p12 = scmp.lt.s32.totalorder %s1408_s10, %s1022_s4 }
  0x76   : > { %781 = vmatmul.mubr.msk.bf16.vlgmr.msra.gmra.mxu0 %vm421_vm1, %v396_v5  ;;  %789 = vmatmul.mubr.msk.bf16.vlgmr.msra.gmra.mxu1 %vm421_vm1, %v397_v6  ;;  %p1019_p5 = pnand %p1018_p4, %p1314_p7  ;;  %p1025_p0 = scmp.lt.s32.totalorder %s1023_s20, %s1017_s23 }
  0x77   : > { %s1406_s5 = scalar_lea.hbm %s1532_s15, %s765_s17 }
  0x78   : > { %s1413_s11 = scalar_lea.hbm %s1533_s9, %s765_s17  ;;  %p1020_p9 = pneg %p1019_p5 }
  0x79   : > { %p1026_p1 = por %p1025_p0, %p1024_p12 }
  0x7b   : > { %p1027_p2 = pnand %p1026_p1, %p1020_p9 }
 0x136   : > { %v459_v9 = vpop.f32.mrf.mxu0  ;;  %v525_v11 = vpop.f32.mrf.mxu1 }
 0x137   : > { %v460_v10 = vadd.f32 %v754_v7, %v459_v9  ;;  %v526_v12 = vadd.f32 %v758_v8, %v525_v11 }
 0x138   : > { %v782_v13 = vpop.f32.mrf.mxu0  ;;  %v790_v15 = vpop.f32.mrf.mxu1 }
 0x139   : > { %v531_v14 = vpack.c.bf16 %v460_v10, %v460_v10  ;;  %v534_v16 = vpack.c.bf16 %v526_v12, %v526_v12 }
 0x13a   : > { %v462_v17 = vpop.f32.mrf.mxu0  ;;  %v528_v18 = vpop.f32.mrf.mxu1 }
 0x13b   : > { %533 = vst.msk [vmem:[%s387_s22] sm:$0xf] %vm532_vm2, %v531_v14 }
 0x13c   : > { %v783_v19 = vpop.f32.mrf.mxu0 }
 0x13d   : > { %1030 = shalt.err (!%p1027_p2)
}
 0x13e   : > { %s1031_s17 = scalar_lea.hbm %s1406_s5, 64  ;;  %s1035_s21 = scalar_lea.hbm %s1532_s15, 256 }
 0x13f   : > { %p1032_p6 = scmp.ne.s32.totalorder %s1406_s5, %s1031_s17  ;;  %p1036_p13 = scmp.lt.s32.totalorder %s1406_s5, %s1532_s15 }
 0x140   : > { %p1037_p3 = scmp.lt.s32.totalorder %s1035_s21, %s1031_s17 }
 0x141   : > { %p1033_p11 = pnand %p1032_p6, %p1314_p7 }
 0x142   : > { %p1038_p10 = por %p1037_p3, %p1036_p13 }
 0x143   : > { %p1034_p8 = pneg %p1033_p11 }
 0x145   : > { %p1039_p4 = pnand %p1038_p10, %p1034_p8 }
 0x147   : > { %1042 = shalt.err (!%p1039_p4)
}
 0x148   : > { %804 = dma.vmem_to_hbm [thread:$0]  (%p1314_p7), %s1408_s10, 64, %s1406_s5, %s537_s16   ;;  %535 = vst.msk [vmem:[%s394_s6] sm:$0xf] %vm532_vm2, %v534_v16  ;;  %v791_v20 = vpop.f32.mrf.mxu1 }
 0x149   : > { %s542_s23 = scalar_lea.sflag [#allocation12], %s1366_s12  ;;  %s1043_s14 = scalar_lea.vmem %s1415_s7, 64 }
 0x14a   : > { %p1044_p5 = scmp.ne.s32.totalorder %s1415_s7, %s1043_s14  ;;  %s1166_s4 = smov [#allocation11]  }
 0x14b   : > { %s1047_s20 = sshll.u32 %s1166_s4, 4  ;;  %s1048_s20 = int_to_ptr.vmem [resolvable:$false] %s1047_s20 }
 0x14c   : > { %p1045_p9 = pnand %p1044_p5, %p1314_p7  ;;  %s1049_s17 = scalar_lea.vmem %s1048_s20, 128 }
 0x14d   : > { %p1050_p0 = scmp.lt.s32.totalorder %s1415_s7, %s1048_s20  ;;  %p1051_p1 = scmp.lt.s32.totalorder %s1049_s17, %s1043_s14 }
 0x14e   : > { %p1046_p12 = pneg %p1045_p9 }
 0x14f   : > { %p1052_p2 = por %p1051_p1, %p1050_p0 }
 0x151   : > { %p1053_p6 = pnand %p1052_p2, %p1046_p12 }
 0x153   : > { %1056 = shalt.err (!%p1053_p6)
}
 0x154   : > { %s1057_s18 = scalar_lea.hbm %s1413_s11, 64  ;;  %s1061_s6 = scalar_lea.hbm %s1533_s9, 256 }
 0x155   : > { %p1058_p11 = scmp.ne.s32.totalorder %s1413_s11, %s1057_s18  ;;  %p1062_p3 = scmp.lt.s32.totalorder %s1413_s11, %s1533_s9 }
 0x156   : > { %p1063_p10 = scmp.lt.s32.totalorder %s1061_s6, %s1057_s18 }
 0x157   : > { %p1059_p8 = pnand %p1058_p11, %p1314_p7 }
 0x158   : > { %p1064_p4 = por %p1063_p10, %p1062_p3 }
 0x159   : > { %p1060_p13 = pneg %p1059_p8 }
 0x15b   : > { %p1065_p5 = pnand %p1064_p4, %p1060_p13 }
 0x15d   : > { %1068 = shalt.err (!%p1065_p5)
}
 0x15e   : > { %805 = dma.vmem_to_hbm [thread:$0]  (%p1314_p7), %s1415_s7, 64, %s1413_s11, %s542_s23  }
 0x15f PF: > { %s1534_s22 = sld [smem:[#allocation19_spill]]  ;;  %p834_p9 = scmp.ge.s32.totalorder %s1155_s8, 2 }
 0x160   : > { %s1535_s28 = sld [smem:[#allocation20_spill]] }
 0x165   : > { %s584_s21 = sand.u32 1, %s1534_s22  }
 0x166   : > { %p1536_p12 = scmp.ne.s32.totalorder %s1535_s28, 0  ;;  %s585_s13 = scalar_lea.sflag [#allocation4], %s584_s21 }
 0x168   : > { %p823_p0 = pnand %p834_p9, %p1536_p12 }
 0x16a   : > { %p824_p1 = pneg %p823_p0 }
 0x16c   : > { %1118 = dma.done.wait (%p824_p1), %s585_s13, 64  }
 0x16d   : > { %1120 = vsyncadd (%p824_p1), %s585_s13, 4294967232  ;;  %s594_s2 = scalar_lea.sflag [#allocation12], %s584_s21 }
 0x16e   : > { %1122 = dma.done.wait (%p824_p1), %s594_s2, 64  }
 0x16f   : > { %1124 = vsyncadd (%p824_p1), %s594_s2, 4294967232  ;;  %s31_s8 = sadd.s32 1, %s1155_s8   ;;  %s1537_s7 = smov %s1330_s24 }
 0x170   : > { %p28_p2 = scmp.ge.s32.totalorder %s31_s8, 6   ;;  %s1538_s11 = sld [smem:[#allocation21_spill]] }
 0x171   : > { %s1539_s24 = smov %s1131_s25  ;;  %s1540_s25 = smov %s1135_s26 }
 0x172   : > { %s1541_s26 = smov %s1537_s7  ;;  %s1542_s27 = smov %s1147_s29 }
 0x173   : > { %s1543_s28 = smov %s1151_s30  ;;  %s1545_s30 = smov %s1551_s19 }
 0x174   :  { %30 = sbr.rel (!%p28_p2) target bundleno = 18 (0x12), region = 127 }
 0x176   : > { %s1544_s29 = smov %s1538_s11 }
 0x179   :  { %599 = vsyncpa [#allocation3], 1 }
 0x17a   :  { %601 = vsyncpa [#allocation3 + $0x1], 1 }
 0x17b   :  { %602 = vsyncpa [#allocation6], 1 }
 0x17c   :  { %604 = vsyncpa [#allocation6 + $0x1], 1 }
 0x17d   :  { %605 = vsyncpa [#allocation9], 1 }
 0x17e   :  { %606 = vsyncpa [#allocation4], 1 }
 0x17f   :  { %608 = vsyncpa [#allocation4 + $0x1], 1 }
 0x180   :  { %609 = vsyncpa [#allocation12], 1 }
 0x181   :  { %611 = vsyncpa [#allocation12 + $0x1], 1 }

// kernel: tpu_custom_call.1
= control target key start
LH: loop header
LB: loop body
LE: loop exit
PB: predicated region body
PF: predicated region fallthrough
CT: control target
= control target key end

     0   :  { %s1491_s0 = inlined_call_operand.hbm [shape: bf16[2,16,32], index: 0, kind: input, shape index: {}]   ;;  %s1492_s1 = inlined_call_operand.hbm [shape: bf16[2,16,32], index: 1, kind: input, shape index: {}]   ;;  %s1493_s2 = inlined_call_operand.hbm [shape: bf16[32,32], index: 2, kind: input, shape index: {}]   ;;  %s1494_s3 = inlined_call_operand.vmem [shape: f32[1,32], index: 3, kind: input, shape index: {}]   ;;  %s1495_s4 = inlined_call_operand.hbm [shape: bf16[32,32], index: 4, kind: input, shape index: {}]   ;;  %s1496_s5 = inlined_call_operand.vmem [shape: f32[1,32], index: 5, kind: input, shape index: {}]   ;;  %s1497_s6 = inlined_call_operand.hbm [shape: bf16[2,16,32], index: 6, kind: output, shape index: {0}]   ;;  %s1498_s7 = inlined_call_operand.hbm [shape: bf16[2,16,32], index: 7, kind: output, shape index: {1}]  }
   0x1   :  { %1507 = sst [smem:[#allocation23_spill]] %s1493_s2 }
   0x2   :  { %1508 = sst [smem:[#allocation24_spill]] %s1495_s4 }
   0x3   :  { %1509 = sst [smem:[#allocation25_spill]] %s1496_s5 }
   0x4   :  { %1510 = sst [smem:[#allocation26_spill]] %s1497_s6 }
   0x5   :  { %1511 = sst [smem:[#allocation27_spill]] %s1498_s7 }
   0x6   :  { %13 = vsyncpa [#allocation3], 0 }
   0x7   :  { %15 = vsyncpa [#allocation3 + $0x1], 0 }
   0x8   :  { %16 = vsyncpa [#allocation6], 0 }
   0x9   :  { %18 = vsyncpa [#allocation6 + $0x1], 0 }
   0xa   :  { %19 = vsyncpa [#allocation9], 0 }
   0xb   :  { %20 = vsyncpa [#allocation4], 0 }
   0xc   :  { %22 = vsyncpa [#allocation4 + $0x1], 0 }
   0xd   :  { %23 = vsyncpa [#allocation12], 0 }
   0xe   :  { %25 = vsyncpa [#allocation12 + $0x1], 0  ;;  %s1207_s24 = smov 0   ;;  %s1209_s25 = smov 0  }
   0xf   :  { %s1211_s26 = smov 0   ;;  %s1213_s27 = smov 0  }
  0x10   :  { %s1215_s28 = smov 0   ;;  %s1217_s29 = smov 0  }
  0x11   :  { %s1219_s30 = smov 0   ;;  %s1221_s8 = smov 0  }
  0x12 LB: > { %1512 = sst [smem:[#allocation19_spill]] %s1127_s24  ;;  %s1248_s9 = sadd.s32 4294967295, %s1155_s8   ;;  %s1155_s8 = sphi %s1221_s8, %s31_s8   ;;  %s1151_s30 = sphi %s1219_s30, %s1545_s30   ;;  %s1147_s29 = sphi %s1217_s29, %s1544_s29   ;;  %s1143_s28 = sphi %s1215_s28, %s1543_s28   ;;  %s1139_s27 = sphi %s1213_s27, %s1542_s27   ;;  %s1135_s26 = sphi %s1211_s26, %s1541_s26   ;;  %s1131_s25 = sphi %s1209_s25, %s1540_s25   ;;  %s1127_s24 = sphi %s1207_s24, %s1539_s24  }
  0x13   : > { %s736_s10 = sadd.s32 4294967294, %s1155_s8   ;;  %p65_p0 = scmp.ne.s32.totalorder %s1131_s25, %s1127_s24 }
  0x14   : > { %p1499_p1 = scmp.eq.s32.totalorder %s1248_s9, 0  ;;  %p209_p3 = scmp.eq.s32.totalorder %s736_s10, 3 }
  0x15   : > { %p737_p5 = scmp.ge.s32.totalorder %s1155_s8, 1  ;;  %p244_p7 = scmp.lt.s32.totalorder %s1155_s8, 5 }
  0x16   : > { %p1257_p4 = por %p1499_p1, %p65_p0  ;;  %p1262_p6 = por %p209_p3, %p65_p0 }
  0x17   : > { %p1267_p8 = pnand %p737_p5, %p244_p7  ;;  %s1157_s14 = smov [#allocation7]  }
  0x18   : > { %s1514_s12 = scalar_select %p1262_p6, 1, 0 }
  0x19   : > { %s256_s15 = sshll.u32 %s1157_s14, 4  ;;  %p808_p9 = pneg %p1267_p8  ;;  %s257_s15 = int_to_ptr.vmem [resolvable:$true] %s256_s15 }
  0x1a   : > { %1515 = sst [smem:[#allocation20_spill]] %s1514_s12  ;;  %s1158_s17 = smov [#allocation8]  }
  0x1b   : > { %p1275_p10 = pnand %p808_p9, %p1499_p1  ;;  %s272_s18 = sshll.u32 %s1158_s17, 4  ;;  %s273_s18 = int_to_ptr.vmem [resolvable:$true] %s272_s18 }
  0x1c   : > { %s920_s19 = scalar_lea.vmem %s257_s15, 256  ;;  %p928_p3 = scmp.lt.s32.totalorder %s257_s15, %s257_s15 }
  0x1d   : > { %p911_p11 = pneg %p1275_p10  ;;  %p921_p12 = scmp.ne.s32.totalorder %s257_s15, %s920_s19 }
  0x1e   : > { %p929_p5 = scmp.lt.s32.totalorder %s920_s19, %s920_s19 }
  0x1f   : > { %p923_p13 = pnand %p921_p12, %p911_p11 }
  0x20   : > { %p930_p7 = por %p929_p5, %p928_p3 }
  0x21   : > { %p924_p0 = pneg %p923_p13 }
  0x23   : > { %p931_p9 = pnand %p930_p7, %p924_p0 }
  0x25   : > { %934 = shalt.err (!%p931_p9)
}
  0x26   : > { %s1159_s20 = smov 64   ;;  %s1160_s21 = smov 4  }
  0x27   : > { %s1518_s2 = sld [smem:[#allocation23_spill]]  ;;  %s946_s10 = scalar_lea.vmem %s273_s18, 256 }
  0x28   : > { %p947_p1 = scmp.ne.s32.totalorder %s273_s18, %s946_s10  ;;  %p954_p2 = scmp.lt.s32.totalorder %s273_s18, %s273_s18 }
  0x29   : > { %p955_p6 = scmp.lt.s32.totalorder %s946_s10, %s946_s10 }
  0x2a   : > { %p949_p12 = pnand %p947_p1, %p911_p11 }
  0x2b   : > { %p956_p3 = por %p955_p6, %p954_p2 }
  0x2c   : > { %p950_p13 = pneg %p949_p12 }
  0x2d   : > { %811 = dma.hbm_to_vmem [thread:$0]  (!%p1275_p10), %s1518_s2, 256, %s257_s15, [#allocation6], %s1159_s20, %s1159_s20, %s1160_s21  }
  0x2e   : > { %p957_p0 = pnand %p956_p3, %p950_p13 }
  0x30   : > { %960 = shalt.err (!%p957_p0)
}
  0x31   : > { %s1519_s4 = sld [smem:[#allocation24_spill]]  ;;  %s40_s15 = sadd.s32 1, %s1147_s29 }
  0x32   : > { %s43_s19 = sadd.s32 1, %s1151_s30  ;;  %p41_p1 = scmp.ge.s32.totalorder %s40_s15, 2 }
  0x33   : > { %s52_s16 = sadd.s32 1, %s1135_s26  ;;  %p59_p2 = scmp.ne.s32.totalorder %s1135_s26, %s1131_s25 }
  0x34   : > { %p60_p6 = scmp.eq.s32.totalorder %s1155_s8, 0  ;;  %s1547_s15 = smov (%p41_p1, %s40_s15), 0 }
  0x35   : > { %1520 = sst [smem:[#allocation21_spill]] %s1547_s15  ;;  %s1549_s19 = smov (!%p41_p1, %s43_s19), %s1151_s30 }
  0x36   : > { %s48_s22 = ssub.s32 %s1147_s29, %s1547_s15  ;;  %p1308_p11 = por %p60_p6, %p59_p2 }
  0x37   : > { %814 = dma.hbm_to_vmem [thread:$0]  (!%p1275_p10), %s1519_s4, 256, %s273_s18, [#allocation9], %s1159_s20, %s1159_s20, %s1160_s21  }
  0x38   : > { %p45_p10 = scmp.ge.s32.totalorder %s1549_s19, 2  ;;  %p1522_p5 = scmp.eq.s32.totalorder %s1248_s9, 3 }
  0x39   : > { %p831_p9 = scmp.lt.s32.totalorder %s1155_s8, 4  ;;  %s289_s20 = sand.u32 1, %s1135_s26  }
  0x3a   : > { %p1314_p7 = por %p1522_p5, %p59_p2  ;;  %s1551_s19 = smov (%p45_p10, %s1549_s19), 0 }
  0x3b   : > { %s1322_s21 = sshll.u32 %s289_s20, 2  ;;  %s47_s10 = ssub.s32 %s1151_s30, %s1551_s19 }
  0x3c   : > { %s1523_s18 = scalar_select %p1314_p7, 1, 0 }
  0x3d   : > { %s49_s14 = sor.u32 %s48_s22, %s47_s10  ;;  %s742_s17 = sshll.u32 %s1151_s30, 1 }
  0x3e   : > { %1524 = sst [smem:[#allocation22_spill]] %s1523_s18  ;;  %p50_p12 = scmp.eq.s32.totalorder %s49_s14, 0 }
  0x3f   : > { %s298_s2 = sadd.s32 %s1147_s29, %s742_s17  ;;  %s293_s15 = scalar_lea.vmem [#allocation2], %s1322_s21 }
  0x40   : > { %s743_s4 = sshll.u32 %s298_s2, 6  ;;  %s302_s12 = sshll.u32 %s293_s15, 4  ;;  %s303_s12 = int_to_ptr.vmem [resolvable:$true] %s302_s12 }
  0x41   : > { %s1330_s24 = scalar_select %p50_p12, %s1135_s26, %s52_s16  }
  0x42   : > { %s300_s18 = scalar_lea.hbm %s1491_s0, %s743_s4  ;;  %p1339_p13 = pnand %p831_p9, %p1308_p11 }
  0x43   : > { %s1346_s2 = scalar_lea.hbm %s1492_s1, %s743_s4  ;;  %s309_s15 = sand.u32 1, %s1155_s8  }
  0x44   : > { %s290_s16 = scalar_lea.sflag [#allocation3], %s289_s20  ;;  %p963_p3 = pneg %p1339_p13 }
  0x45   : > { %s974_s6 = scalar_lea.vmem %s303_s12, 64  ;;  %s1161_s7 = smov [#allocation2]  }
  0x46   : > { %p975_p0 = scmp.ne.s32.totalorder %s303_s12, %s974_s6  ;;  %s979_s23 = sshll.u32 %s1161_s7, 4  ;;  %s980_s23 = int_to_ptr.vmem [resolvable:$false] %s979_s23 }
  0x47   : > { %s981_s14 = scalar_lea.vmem %s980_s23, 128  ;;  %p982_p6 = scmp.lt.s32.totalorder %s303_s12, %s980_s23 }
  0x48   : > { %p977_p1 = pnand %p975_p0, %p963_p3  ;;  %p983_p11 = scmp.lt.s32.totalorder %s981_s14, %s974_s6 }
  0x4a   : > { %p978_p2 = pneg %p977_p1  ;;  %p984_p10 = por %p983_p11, %p982_p6 }
  0x4c   : > { %p985_p5 = pnand %p984_p10, %p978_p2 }
  0x4e   : > { %988 = shalt.err (!%p985_p5)
}
  0x4f   : > { %818 = dma.hbm_to_vmem [thread:$0]  (!%p1339_p13), %s300_s18, 64, %s303_s12, %s290_s16  }
  0x50   : > { %s313_s4 = scalar_lea.vmem [#allocation5], %s1322_s21  ;;  %s310_s17 = scalar_lea.sflag [#allocation6], %s309_s15 }
  0x51   : > { %s322_s20 = sshll.u32 %s313_s4, 4  ;;  %s1162_s10 = smov [#allocation5]   ;;  %s323_s20 = int_to_ptr.vmem [resolvable:$true] %s322_s20 }
  0x52   : > { %s1002_s22 = scalar_lea.vmem %s323_s20, 64  ;;  %s1007_s6 = sshll.u32 %s1162_s10, 4  ;;  %s1008_s6 = int_to_ptr.vmem [resolvable:$false] %s1007_s6 }
  0x53   : > { %p1003_p9 = scmp.ne.s32.totalorder %s323_s20, %s1002_s22  ;;  %s1009_s7 = scalar_lea.vmem %s1008_s6, 128 }
  0x54   : > { %p1010_p1 = scmp.lt.s32.totalorder %s323_s20, %s1008_s6  ;;  %p1011_p2 = scmp.lt.s32.totalorder %s1009_s7, %s1002_s22 }
  0x55   : > { %p1005_p12 = pnand %p1003_p9, %p963_p3 }
  0x56   : > { %p1012_p6 = por %p1011_p2, %p1010_p1 }
  0x57   : > { %p1006_p0 = pneg %p1005_p12 }
  0x59   : > { %p1013_p11 = pnand %p1012_p6, %p1006_p0 }
  0x5b   : > { %1016 = shalt.err (!%p1013_p11)
}
  0x5c   : > { %821 = dma.hbm_to_vmem [thread:$0]  (!%p1339_p13), %s1346_s2, 64, %s323_s20, %s310_s17  }
  0x5d   : > { %331 = sbr.rel (%p1267_p8) target bundleno = 351 (0x15f), region = 44  ;;  %s1366_s12 = sand.u32 (!%p1267_p8), 1, %s1131_s25  }
  0x5e   : > { %s1369_s18 = sshll.u32 (!%p1267_p8), %s1366_s12, 2  ;;  %s334_s21 = scalar_lea.sflag (!%p1267_p8), [#allocation3], %s1366_s12 }
  0x5f   : > { %s337_s15 = scalar_lea.vmem (!%p1267_p8), [#allocation2], %s1369_s18 }
  0x62   : > { %1102 = dma.done.wait (%p1257_p4), %s334_s21, 64  }
  0x63   : > { %1104 = vsyncadd (%p1257_p4), %s334_s21, 4294967232  ;;  %s342_s5 = sand.u32 1, %s1248_s9   ;;  %s346_s2 = scalar_lea.vmem [#allocation5], %s1369_s18 }
  0x64   : > { %s343_s13 = scalar_lea.sflag [#allocation6], %s342_s5 }
  0x65   : > { %1106 = dma.done.wait (%p1257_p4), %s343_s13, 64  }
  0x66   : > { %1108 = vsyncadd (%p1257_p4), %s343_s13, 4294967232  ;;  %p1526_p8 = scmp.eq.s32.totalorder %s1248_s9, 0 }
  0x68   : > { %1110 = dma.done.wait (%p1526_p8), [#allocation6], 256   ;;  %p1527_p13 = pmov %p1526_p8 }
  0x69   : > { %p1528_p3 = pmov %p1526_p8 }
  0x6a   : > { %1112 = vsyncadd (%p1527_p13), [#allocation6], 4294967040 }
  0x6b   : > { %1114 = dma.done.wait (%p1528_p3), [#allocation9], 256   ;;  %p1529_p10 = pmov %p1528_p3 }
  0x6c   : > { %v1163_v0 = vmov 0.0   ;;  %vm1164_vm0 = vmmov 0   ;;  %v905_v1 = vld [vmem:[#allocation7 + $0x8] sm:$0xff]   ;;  %v906_v2 = vld [vmem:[#allocation8 + $0x8] sm:$0xff]   ;;  %v907_v3 = vld [vmem:[#allocation7] sm:$0xff]   ;;  %vm421_vm1 = vcmask 261120  }
  0x6d   : > { %1116 = vsyncadd (%p1529_p10), [#allocation9], 4294967040  ;;  %776 = vmatprep.subr.bf16.mxu0 %v1163_v0  ;;  %784 = vmatprep.subr.bf16.mxu1 %v1163_v0  ;;  %v908_v4 = vld [vmem:[#allocation8] sm:$0xff]   ;;  %v397_v6 = vld [vmem:[%s346_s2] sm:$0xf]  ;;  %s764_s9 = sshll.u32 %s1143_s28, 1 }
  0x6e   : > { %780 = vmatprep.mubr.msk.bf16.mxu0 %vm1164_vm0, %v1163_v0  ;;  %788 = vmatprep.mubr.msk.bf16.mxu1 %vm1164_vm0, %v1163_v0  ;;  %v396_v5 = vld [vmem:[%s337_s15] sm:$0xf]  ;;  %s553_s11 = sadd.s32 %s1139_s27, %s764_s9  ;;  %s1530_s20 = sld [smem:[#allocation25_spill]]  ;;  %vm532_vm2 = vcmask 257024  }
  0x6f   : > { %777 = vmatpush3.bf16.msra.mxu0 %v905_v1  ;;  %785 = vmatpush3.bf16.msra.mxu1 %v906_v2  ;;  %v754_v7 = vld [vmem:[%s1494_s3] ss:$0 sm:$0xff]  ;;  %s765_s17 = sshll.u32 %s553_s11, 6  ;;  %s387_s22 = scalar_lea.vmem [#allocation10], %s1369_s18 }
  0x70   : > { %778 = vmatprep.subr.bf16.mxu0 %v1163_v0  ;;  %786 = vmatprep.subr.bf16.mxu1 %v1163_v0  ;;  %s557_s10 = sshll.u32 %s387_s22, 4  ;;  %s394_s6 = scalar_lea.vmem [#allocation11], %s1369_s18  ;;  %s1408_s10 = int_to_ptr.vmem [resolvable:$true] %s557_s10 }
  0x71   : > { %s572_s7 = sshll.u32 %s394_s6, 4  ;;  %s1532_s15 = sld [smem:[#allocation26_spill]]  ;;  %s1415_s7 = int_to_ptr.vmem [resolvable:$true] %s572_s7 }
  0x72   : > { %s1533_s9 = sld [smem:[#allocation27_spill]]  ;;  %s537_s16 = scalar_lea.sflag [#allocation4], %s1366_s12 }
  0x73   : > { %779 = vmatpush3.bf16.msra.mxu0 %v907_v3  ;;  %787 = vmatpush3.bf16.msra.mxu1 %v908_v4  ;;  %s1017_s23 = scalar_lea.vmem %s1408_s10, 64  ;;  %s1165_s14 = smov [#allocation10]  }
  0x74   : > { %v758_v8 = vld [vmem:[%s1530_s20] ss:$0 sm:$0xff]  ;;  %p1018_p4 = scmp.ne.s32.totalorder %s1408_s10, %s1017_s23  ;;  %s1021_s4 = sshll.u32 %s1165_s14, 4  ;;  %s1022_s4 = int_to_ptr.vmem [resolvable:$false] %s1021_s4 }
  0x75   : > { %s1023_s20 = scalar_lea.vmem %s1022_s4, 128  ;;  %p1024_p12 = scmp.lt.s32.totalorder %s1408_s10, %s1022_s4 }
  0x76   : > { %781 = vmatmul.mubr.msk.bf16.vlgmr.msra.gmra.mxu0 %vm421_vm1, %v396_v5  ;;  %789 = vmatmul.mubr.msk.bf16.vlgmr.msra.gmra.mxu1 %vm421_vm1, %v397_v6  ;;  %p1019_p5 = pnand %p1018_p4, %p1314_p7  ;;  %p1025_p0 = scmp.lt.s32.totalorder %s1023_s20, %s1017_s23 }
  0x77   : > { %s1406_s5 = scalar_lea.hbm %s1532_s15, %s765_s17 }
  0x78   : > { %s1413_s11 = scalar_lea.hbm %s1533_s9, %s765_s17  ;;  %p1020_p9 = pneg %p1019_p5 }
  0x79   : > { %p1026_p1 = por %p1025_p0, %p1024_p12 }
  0x7b   : > { %p1027_p2 = pnand %p1026_p1, %p1020_p9 }
 0x136   : > { %v459_v9 = vpop.f32.mrf.mxu0  ;;  %v525_v11 = vpop.f32.mrf.mxu1 }
 0x137   : > { %v460_v10 = vadd.f32 %v754_v7, %v459_v9  ;;  %v526_v12 = vadd.f32 %v758_v8, %v525_v11 }
 0x138   : > { %v782_v13 = vpop.f32.mrf.mxu0  ;;  %v790_v15 = vpop.f32.mrf.mxu1 }
 0x139   : > { %v531_v14 = vpack.c.bf16 %v460_v10, %v460_v10  ;;  %v534_v16 = vpack.c.bf16 %v526_v12, %v526_v12 }
 0x13a   : > { %v462_v17 = vpop.f32.mrf.mxu0  ;;  %v528_v18 = vpop.f32.mrf.mxu1 }
 0x13b   : > { %533 = vst.msk [vmem:[%s387_s22] sm:$0xf] %vm532_vm2, %v531_v14 }
 0x13c   : > { %v783_v19 = vpop.f32.mrf.mxu0 }
 0x13d   : > { %1030 = shalt.err (!%p1027_p2)
}
 0x13e   : > { %s1031_s17 = scalar_lea.hbm %s1406_s5, 64  ;;  %s1035_s21 = scalar_lea.hbm %s1532_s15, 256 }
 0x13f   : > { %p1032_p6 = scmp.ne.s32.totalorder %s1406_s5, %s1031_s17  ;;  %p1036_p13 = scmp.lt.s32.totalorder %s1406_s5, %s1532_s15 }
 0x140   : > { %p1037_p3 = scmp.lt.s32.totalorder %s1035_s21, %s1031_s17 }
 0x141   : > { %p1033_p11 = pnand %p1032_p6, %p1314_p7 }
 0x142   : > { %p1038_p10 = por %p1037_p3, %p1036_p13 }
 0x143   : > { %p1034_p8 = pneg %p1033_p11 }
 0x145   : > { %p1039_p4 = pnand %p1038_p10, %p1034_p8 }
 0x147   : > { %1042 = shalt.err (!%p1039_p4)
}
 0x148   : > { %804 = dma.vmem_to_hbm [thread:$0]  (%p1314_p7), %s1408_s10, 64, %s1406_s5, %s537_s16   ;;  %535 = vst.msk [vmem:[%s394_s6] sm:$0xf] %vm532_vm2, %v534_v16  ;;  %v791_v20 = vpop.f32.mrf.mxu1 }
 0x149   : > { %s542_s23 = scalar_lea.sflag [#allocation12], %s1366_s12  ;;  %s1043_s14 = scalar_lea.vmem %s1415_s7, 64 }
 0x14a   : > { %p1044_p5 = scmp.ne.s32.totalorder %s1415_s7, %s1043_s14  ;;  %s1166_s4 = smov [#allocation11]  }
 0x14b   : > { %s1047_s20 = sshll.u32 %s1166_s4, 4  ;;  %s1048_s20 = int_to_ptr.vmem [resolvable:$false] %s1047_s20 }
 0x14c   : > { %p1045_p9 = pnand %p1044_p5, %p1314_p7  ;;  %s1049_s17 = scalar_lea.vmem %s1048_s20, 128 }
 0x14d   : > { %p1050_p0 = scmp.lt.s32.totalorder %s1415_s7, %s1048_s20  ;;  %p1051_p1 = scmp.lt.s32.totalorder %s1049_s17, %s1043_s14 }
 0x14e   : > { %p1046_p12 = pneg %p1045_p9 }
 0x14f   : > { %p1052_p2 = por %p1051_p1, %p1050_p0 }
 0x151   : > { %p1053_p6 = pnand %p1052_p2, %p1046_p12 }
 0x153   : > { %1056 = shalt.err (!%p1053_p6)
}
 0x154   : > { %s1057_s18 = scalar_lea.hbm %s1413_s11, 64  ;;  %s1061_s6 = scalar_lea.hbm %s1533_s9, 256 }
 0x155   : > { %p1058_p11 = scmp.ne.s32.totalorder %s1413_s11, %s1057_s18  ;;  %p1062_p3 = scmp.lt.s32.totalorder %s1413_s11, %s1533_s9 }
 0x156   : > { %p1063_p10 = scmp.lt.s32.totalorder %s1061_s6, %s1057_s18 }
 0x157   : > { %p1059_p8 = pnand %p1058_p11, %p1314_p7 }
 0x158   : > { %p1064_p4 = por %p1063_p10, %p1062_p3 }
 0x159   : > { %p1060_p13 = pneg %p1059_p8 }
 0x15b   : > { %p1065_p5 = pnand %p1064_p4, %p1060_p13 }
 0x15d   : > { %1068 = shalt.err (!%p1065_p5)
}
 0x15e   : > { %805 = dma.vmem_to_hbm [thread:$0]  (%p1314_p7), %s1415_s7, 64, %s1413_s11, %s542_s23  }
 0x15f PF: > { %s1534_s22 = sld [smem:[#allocation19_spill]]  ;;  %p834_p9 = scmp.ge.s32.totalorder %s1155_s8, 2 }
 0x160   : > { %s1535_s28 = sld [smem:[#allocation20_spill]] }
 0x165   : > { %s584_s21 = sand.u32 1, %s1534_s22  }
 0x166   : > { %p1536_p12 = scmp.ne.s32.totalorder %s1535_s28, 0  ;;  %s585_s13 = scalar_lea.sflag [#allocation4], %s584_s21 }
 0x168   : > { %p823_p0 = pnand %p834_p9, %p1536_p12 }
 0x16a   : > { %p824_p1 = pneg %p823_p0 }
 0x16c   : > { %1118 = dma.done.wait (%p824_p1), %s585_s13, 64  }
 0x16d   : > { %1120 = vsyncadd (%p824_p1), %s585_s13, 4294967232  ;;  %s594_s2 = scalar_lea.sflag [#allocation12], %s584_s21 }
 0x16e   : > { %1122 = dma.done.wait (%p824_p1), %s594_s2, 64  }
 0x16f   : > { %1124 = vsyncadd (%p824_p1), %s594_s2, 4294967232  ;;  %s31_s8 = sadd.s32 1, %s1155_s8   ;;  %s1537_s7 = smov %s1330_s24 }
 0x170   : > { %p28_p2 = scmp.ge.s32.totalorder %s31_s8, 6   ;;  %s1538_s11 = sld [smem:[#allocation21_spill]] }
 0x171   : > { %s1539_s24 = smov %s1131_s25  ;;  %s1540_s25 = smov %s1135_s26 }
 0x172   : > { %s1541_s26 = smov %s1537_s7  ;;  %s1542_s27 = smov %s1147_s29 }
 0x173   : > { %s1543_s28 = smov %s1151_s30  ;;  %s1545_s30 = smov %s1551_s19 }
 0x174   :  { %30 = sbr.rel (!%p28_p2) target bundleno = 18 (0x12), region = 127 }
 0x176   : > { %s1544_s29 = smov %s1538_s11 }
 0x179   :  { %599 = vsyncpa [#allocation3], 1 }
 0x17a   :  { %601 = vsyncpa [#allocation3 + $0x1], 1 }
 0x17b   :  { %602 = vsyncpa [#allocation6], 1 }
 0x17c   :  { %604 = vsyncpa [#allocation6 + $0x1], 1 }
 0x17d   :  { %605 = vsyncpa [#allocation9], 1 }
 0x17e   :  { %606 = vsyncpa [#allocation4], 1 }
 0x17f   :  { %608 = vsyncpa [#allocation4 + $0x1], 1 }
 0x180   :  { %609 = vsyncpa [#allocation12], 1 }
 0x181   :  { %611 = vsyncpa [#allocation12 + $0x1], 1 }

</bundles_post_ra>
